<compile_context>
chip_gen: v7x
topology: tpu7x:2x2x1
jax: 0.10.0
libtpu: 0.0.40
codegen_flags: <defaults>
</compile_context>

<pallas_src>
import numpy as np
import jax
import jax.numpy as jnp
from jax.experimental import pallas as pl
from jax.experimental.pallas import tpu as pltpu


HPARAMS = dict(
    sf=16000,
    num_filters=[8, 8],
    filter_lens=[65, 5],
    max_pool_lens=[2, 2],
    drop_probs=[0.0, 0.0],          # eval / p=0 -> identity
    act_funs=["relu", "relu"],
    input_dim=200,
    input_normalization="layernorm",
    normalization=["layernorm", "layernorm"],
)

_EPS = 1e-5


# ----------------------------------------------------------------------------
# Parameter construction (deterministic)
# ----------------------------------------------------------------------------
def make_sinc_filters(n_filt, kernel_size, sf, min_low_hz=50.0, min_band_hz=50.0):
    """Replicates SincConv_fast filter construction (forward-time filters)."""
    if kernel_size % 2 == 0:
        kernel_size += 1

    def to_mel(hz):
        return 2595.0 * np.log10(1.0 + hz / 700.0)

    def to_hz(mel):
        return 700.0 * (10.0 ** (mel / 2595.0) - 1.0)

    low_hz0, high_hz0 = 30.0, sf / 2.0 - (min_low_hz + min_band_hz)
    mel = np.linspace(to_mel(low_hz0), to_mel(high_hz0), n_filt + 1)
    hz = to_hz(mel)
    low_hz_ = hz[:-1].reshape(-1, 1)
    band_hz_ = np.diff(hz).reshape(-1, 1)

    low = min_low_hz + np.abs(low_hz_)
    high = np.clip(low + min_band_hz + np.abs(band_hz_), min_low_hz, sf / 2.0)
    band = (high - low)[:, 0]

    n_lin = np.linspace(0.0, (kernel_size / 2.0) - 1.0, int(kernel_size / 2))
    window = 0.54 - 0.46 * np.cos(2.0 * np.pi * n_lin / kernel_size)
    n_half = (kernel_size - 1) / 2.0
    n_ = 2.0 * np.pi * np.arange(-n_half, 0.0).reshape(1, -1) / sf

    f_low = low @ n_
    f_high = high @ n_
    bp_left = ((np.sin(f_high) - np.sin(f_low)) / (n_ / 2.0)) * window
    bp_center = 2.0 * band.reshape(-1, 1)
    bp_right = bp_left[:, ::-1]
    bp = np.concatenate([bp_left, bp_center, bp_right], axis=1)
    bp = bp / (2.0 * band[:, None])
    return bp.reshape(n_filt, 1, kernel_size).astype(np.float32)


def build_params(hp, key):
    C0, C1 = (int(n) for n in hp["num_filters"])
    K0, K1 = (int(k) for k in hp["filter_lens"])
    # Layer 0: SincConv_fast filters (no bias).
    w0 = jnp.asarray(make_sinc_filters(C0, K0, hp["sf"])).reshape(C0, K0)   # (C0, K0)
    # Layer 1: nn.Conv1d(C0, C1, K1) default init (uniform +-1/sqrt(fan_in)).
    fan_in = C0 * K1
    bound = 1.0 / np.sqrt(fan_in)
    kw, kb = jax.random.split(key)
    w1 = jax.random.uniform(kw, (C1, C0, K1), jnp.float32, -bound, bound)
    b1 = jax.random.uniform(kb, (C1,), jnp.float32, -bound, bound)
    return dict(w0=w0, w1=w1, b1=b1)


# ----------------------------------------------------------------------------
# Fused Pallas kernel: both SincNet layers, per-sample
# ----------------------------------------------------------------------------
def _make_fused_kernel(C0, K0, M0, Lp0, C1, K1, M1, input_norm, norms, acts):
    n0 = float(Lp0 * C0)          # layer-0 LayerNorm element count ( = 2 * C0 * M0 )

    def _act(v, kind):
        if kind == "relu":
            return jnp.maximum(v, 0.0)
        if kind == "leaky_relu":
            return jnp.where(v >= 0, v, 0.01 * v)   # torch default negative_slope
        return v

    def kernel(x_ref, xcol_ref, w0_ref, wsum0_ref, w1_ref, b1_ref, o_ref):
        # x_ref:    (1, L0)           raw input (for the input layer-norm statistics)
        # xcol_ref: (4, K0, M0)       im2col phase slabs  xcol[p,k,m] = x[4m + p + k]
        # w0_ref:   (C0, K0)          sinc filters
        # wsum0_ref:(C0, 1)           per-filter tap sums (for the LN correction)
        # w1_ref:   (C1, K1*C0)       layer-1 weights, K folded into the contraction
        # b1_ref:   (C1, 1)
        # o_ref:    (C1, M1)          channel-major output, time on the lane axis
        w0 = w0_ref[...]

        if input_norm:
            x = x_ref[...]
            mu0 = jnp.mean(x)
            inv0 = jax.lax.rsqrt(jnp.mean(jnp.square(x - mu0)) + _EPS)
            corr = mu0 * wsum0_ref[...]            # (C0, 1)

        # ---- layer 0: SincConv on 4 pool phases, |.|, pairwise max-pool (P=2) ----
        def conv0(p):
            raw = jnp.dot(w0, xcol_ref[p], preferred_element_type=jnp.float32)  # (C0, M0)
            if input_norm:
                raw = (raw - corr) * inv0          # == conv(layer-normalized x), exactly
            return jnp.abs(raw)                    # SincConv_fast has no bias

        h_even = jnp.maximum(conv0(0), conv0(1))   # pooled columns 0,2,4,...  (C0, M0)
        h_odd = jnp.maximum(conv0(2), conv0(3))    # pooled columns 1,3,5,...  (C0, M0)

        # layer-0 LayerNorm over the whole (C0, Lp0) sample (identity affine), then act.
        if norms[0]:
            mu1 = (jnp.sum(h_even) + jnp.sum(h_odd)) / n0
            var1 = (jnp.sum(jnp.square(h_even - mu1))
                    + jnp.sum(jnp.square(h_odd - mu1))) / n0
            inv1 = jax.lax.rsqrt(var1 + _EPS)
            h_even = (h_even - mu1) * inv1
            h_odd = (h_odd - mu1) * inv1
        h_even = _act(h_even, acts[0])
        h_odd = _act(h_odd, acts[0])
        # dropout p=0 -> identity

        # ---- layer 1: one contraction-(K1*C0) matmul per pool phase, |.|+bias, max ----
        def piece(s):
            # s = pool_phase + tap; layer-0 time index is 2j + s  -> contiguous slice
            # of the even/odd half (no strided access needed).
            src = h_even if (s % 2 == 0) else h_odd
            a = s // 2
            return src[:, a:a + M1]                # (C0, M1)

        slab_e = jnp.concatenate([piece(k) for k in range(K1)], axis=0)       # (K1*C0, M1)
        slab_o = jnp.concatenate([piece(k + 1) for k in range(K1)], axis=0)   # (K1*C0, M1)

        w1 = w1_ref[...]
        b1 = b1_ref[...]
        y_e = jnp.abs(jnp.dot(w1, slab_e, preferred_element_type=jnp.float32) + b1)
        y_o = jnp.abs(jnp.dot(w1, slab_o, preferred_element_type=jnp.float32) + b1)
        h1 = jnp.maximum(y_e, y_o)                 # max-pool (P=2)  -> (C1, M1)

        if norms[1]:
            mu2 = jnp.mean(h1)
            inv2 = jax.lax.rsqrt(jnp.mean(jnp.square(h1 - mu2)) + _EPS)
            h1 = (h1 - mu2) * inv2
        h1 = _act(h1, acts[1])

        o_ref[...] = h1

    return kernel


def make_forward(hp):
    L0 = int(hp["input_dim"])
    C0, C1 = (int(n) for n in hp["num_filters"])
    K0, K1 = (int(k) for k in hp["filter_lens"])
    P0, P1 = (int(p) for p in hp["max_pool_lens"])
    assert P0 == 2 and P1 == 2, "fused kernel is specialized for max_pool_len == 2"

    Lc0 = L0 - K0 + 1                 # 136
    PH = P0 * P1                      # 4 layer-0 pool phases (mod-4 split)
    assert Lc0 % PH == 0
    Lp0 = Lc0 // P0                   # 68
    M0 = Lc0 // PH                    # 34  per-phase layer-0 length
    Lc1 = Lp0 - K1 + 1                # 64
    assert Lc1 % P1 == 0
    M1 = Lc1 // P1                    # 32
    assert K1 // 2 + M1 <= M0
    out_dim = C1 * M1                 # 256

    kernel = _make_fused_kernel(
        C0, K0, M0, Lp0, C1, K1, M1,
        input_norm=bool(hp["input_normalization"]),
        norms=[bool(n) for n in hp["normalization"]],
        acts=list(hp["act_funs"]),
    )

    # im2col phase-gather indices (built once, constant): xcol[p, k, m] = x[PH*m + p + k]
    idx = (np.arange(PH)[:, None, None]
           + np.arange(K0)[None, :, None]
           + PH * np.arange(M0)[None, None, :]).astype(np.int32)

    def forward(params, x):
        B = x.shape[0]
        x = x.astype(jnp.float32)

        w0 = params["w0"]                                          # (C0, K0)
        wsum0 = jnp.sum(w0, axis=1, keepdims=True)                 # (C0, 1)
        w1f = jnp.transpose(params["w1"], (0, 2, 1)).reshape(C1, K1 * C0)
        b1c = params["b1"].reshape(C1, 1)

        xcol = x[:, idx]                                           # (B, PH, K0, M0)
        xr = x[:, None, :]                                         # (B, 1, L0)

        out = pl.pallas_call(
            kernel,
            out_shape=jax.ShapeDtypeStruct((B, C1, M1), jnp.float32),
            grid=(B,),
            in_specs=[
                pl.BlockSpec((None, 1, L0), lambda i: (i, 0, 0)),
                pl.BlockSpec((None, PH, K0, M0), lambda i: (i, 0, 0, 0)),
                pl.BlockSpec((C0, K0), lambda i: (0, 0)),
                pl.BlockSpec((C0, 1), lambda i: (0, 0)),
                pl.BlockSpec((C1, K1 * C0), lambda i: (0, 0)),
                pl.BlockSpec((C1, 1), lambda i: (0, 0)),
            ],
            out_specs=pl.BlockSpec((None, C1, M1), lambda i: (i, 0, 0)),
            compiler_params=pltpu.CompilerParams(
                dimension_semantics=("parallel",)),
        )(xr, xcol, w0, wsum0, w1f, b1c)

        # torch: (B, C, L).view(B, -1).  `out` is already channel-major (B, C1, M1),
        # so this flatten is a contiguous reshape (no transpose, no copy).
        return out.reshape(B, out_dim)

    return forward, out_dim


# ----------------------------------------------------------------------------
# Pure-JAX reference (sanity check of the fused kernel)
# ----------------------------------------------------------------------------
def reference_forward(params, x, hp):
    B = x.shape[0]
    x = x.astype(jnp.float32)
    if hp["input_normalization"]:
        mu = jnp.mean(x, axis=-1, keepdims=True)
        var = jnp.mean(jnp.square(x - mu), axis=-1, keepdims=True)
        x = (x - mu) / jnp.sqrt(var + _EPS)
    h = x[:, None, :]                                  # (B, 1, L)  NCL
    ws = [params["w0"][:, None, :], params["w1"]]
    bs = [jnp.zeros((params["w0"].shape[0],), jnp.float32), params["b1"]]
    for i in range(2):
        y = jax.lax.conv_general_dilated(
            h, ws[i], window_strides=(1,), padding="VALID",
            dimension_numbers=("NCH", "OIH", "NCH"),
            precision=jax.lax.Precision.HIGHEST)
        y = jnp.abs(y + bs[i][None, :, None])
        Bq, C, Lo = y.shape
        P = int(hp["max_pool_lens"][i])
        Lp = Lo // P
        y = y[:, :, :Lp * P].reshape(Bq, C, Lp, P).max(axis=-1)
        if hp["normalization"][i]:
            mu = jnp.mean(y, axis=(1, 2), keepdims=True)
            var = jnp.mean(jnp.square(y - mu), axis=(1, 2), keepdims=True)
            y = (y - mu) / jnp.sqrt(var + _EPS)
        if hp["act_funs"][i] == "relu":
            y = jnp.maximum(y, 0.0)
        elif hp["act_funs"][i] == "leaky_relu":
            y = jnp.where(y >= 0, y, 0.01 * y)
        h = y
    return h.reshape(B, -1)


if __name__ == "__main__":
    key = jax.random.PRNGKey(0)
    kx, kp = jax.random.split(key)

    batch = 2
    x = jax.random.normal(kx, (batch, HPARAMS["input_dim"]), jnp.float32)
    params = build_params(HPARAMS, kp)

    forward, out_dim = make_forward(HPARAMS)
    forward_jit = jax.jit(forward)

    out = jax.block_until_ready(forward_jit(params, x))
    assert out.shape == (batch, out_dim), (out.shape, out_dim)

    ref = jax.block_until_ready(reference_forward(params, x, HPARAMS))
    np.testing.assert_allclose(np.asarray(out), np.asarray(ref), atol=0.1, rtol=0.1)

    print("KERNEL_OK")
</pallas_src>

<mosaic_0001>
module attributes {stable_mosaic.version = 11 : i64} {
  func.func @kernel(%arg0: i32, %arg1: memref<1x1x200xf32, #tpu.memory_space<vmem>>, %arg2: memref<1x4x65x34xf32, #tpu.memory_space<vmem>>, %arg3: memref<8x65xf32, #tpu.memory_space<vmem>>, %arg4: memref<8x1xf32, #tpu.memory_space<vmem>>, %arg5: memref<8x40xf32, #tpu.memory_space<vmem>>, %arg6: memref<8x1xf32, #tpu.memory_space<vmem>>, %arg7: memref<1x8x32xf32, #tpu.memory_space<vmem>>) attributes {dimension_semantics = [#tpu.dimension_semantics<parallel>], iteration_bounds = array<i64: 2>, scalar_prefetch = 0 : i64, scratch_operands = 0 : i64, tpu.core_type = #tpu.core_type<tc>, window_params = [{transform_indices = @transform_0, window_bounds = array<i64: 1, 1, 200>}, {transform_indices = @transform_1, window_bounds = array<i64: 1, 4, 65, 34>}, {pipeline_mode = #tpu.pipeline_mode<synchronous>, transform_indices = @transform_2, window_bounds = array<i64: 8, 65>}, {pipeline_mode = #tpu.pipeline_mode<synchronous>, transform_indices = @transform_3, window_bounds = array<i64: 8, 1>}, {pipeline_mode = #tpu.pipeline_mode<synchronous>, transform_indices = @transform_4, window_bounds = array<i64: 8, 40>}, {pipeline_mode = #tpu.pipeline_mode<synchronous>, transform_indices = @transform_5, window_bounds = array<i64: 8, 1>}, {transform_indices = @transform_6, window_bounds = array<i64: 1, 8, 32>}]} {
    %c0 = arith.constant 0 : index
    %c0_0 = arith.constant 0 : index
    %0 = vector.load %arg3[%c0, %c0_0] : memref<8x65xf32, #tpu.memory_space<vmem>>, vector<8x65xf32>
    %c0_1 = arith.constant 0 : index
    %c0_2 = arith.constant 0 : index
    %c0_3 = arith.constant 0 : index
    %1 = vector.load %arg1[%c0_1, %c0_2, %c0_3] : memref<1x1x200xf32, #tpu.memory_space<vmem>>, vector<1x1x200xf32>
    %2 = vector.shape_cast %1 : vector<1x1x200xf32> to vector<1x200xf32>
    %3 = vector.shape_cast %2 : vector<1x200xf32> to vector<1x1x200xf32>
    %cst = arith.constant dense<0.000000e+00> : vector<1xf32>
    %4 = vector.multi_reduction <add>, %3, %cst [1, 2] : vector<1x1x200xf32> to vector<1xf32>
    %5 = vector.shape_cast %4 : vector<1xf32> to vector<1x1x1xf32>
    %6 = vector.extract %5[0, 0, 0] : f32 from vector<1x1x1xf32>
    %cst_4 = arith.constant 2.000000e+02 : f32
    %7 = arith.divf %6, %cst_4 : f32
    %8 = vector.broadcast %7 : f32 to vector<1x200xf32>
    %9 = arith.subf %2, %8 : vector<1x200xf32>
    %10 = arith.mulf %9, %9 : vector<1x200xf32>
    %11 = vector.shape_cast %10 : vector<1x200xf32> to vector<1x1x200xf32>
    %cst_5 = arith.constant dense<0.000000e+00> : vector<1xf32>
    %12 = vector.multi_reduction <add>, %11, %cst_5 [1, 2] : vector<1x1x200xf32> to vector<1xf32>
    %13 = vector.shape_cast %12 : vector<1xf32> to vector<1x1x1xf32>
    %14 = vector.extract %13[0, 0, 0] : f32 from vector<1x1x1xf32>
    %cst_6 = arith.constant 2.000000e+02 : f32
    %15 = arith.divf %14, %cst_6 : f32
    %cst_7 = arith.constant 9.99999974E-6 : f32
    %16 = arith.addf %15, %cst_7 : f32
    %17 = math.rsqrt %16 : f32
    %c0_8 = arith.constant 0 : index
    %c0_9 = arith.constant 0 : index
    %18 = vector.load %arg4[%c0_8, %c0_9] : memref<8x1xf32, #tpu.memory_space<vmem>>, vector<8x1xf32>
    %19 = vector.broadcast %7 : f32 to vector<8x1xf32>
    %20 = arith.mulf %19, %18 : vector<8x1xf32>
    %c0_10 = arith.constant 0 : index
    %c0_11 = arith.constant 0 : index
    %c0_12 = arith.constant 0 : index
    %c0_13 = arith.constant 0 : index
    %21 = vector.load %arg2[%c0_10, %c0_11, %c0_12, %c0_13] : memref<1x4x65x34xf32, #tpu.memory_space<vmem>>, vector<1x1x65x34xf32>
    %22 = vector.shape_cast %21 : vector<1x1x65x34xf32> to vector<65x34xf32>
    %cst_14 = arith.constant dense<0.000000e+00> : vector<8x34xf32>
    %23 = tpu.matmul %0, %22, %cst_14 {dimension_numbers = #tpu.dot_dimension_numbers<[1], [0], [0], [1], [0, 0, 1, 1], [], []>} : vector<8x65xf32>, vector<65x34xf32>, vector<8x34xf32> -> vector<8x34xf32>
    %24 = vector.broadcast %20 : vector<8x1xf32> to vector<8x34xf32>
    %25 = arith.subf %23, %24 : vector<8x34xf32>
    %26 = vector.broadcast %17 : f32 to vector<8x34xf32>
    %27 = arith.mulf %25, %26 : vector<8x34xf32>
    %28 = math.absf %27 : vector<8x34xf32>
    %c0_15 = arith.constant 0 : index
    %c1 = arith.constant 1 : index
    %c0_16 = arith.constant 0 : index
    %c0_17 = arith.constant 0 : index
    %29 = vector.load %arg2[%c0_15, %c1, %c0_16, %c0_17] : memref<1x4x65x34xf32, #tpu.memory_space<vmem>>, vector<1x1x65x34xf32>
    %30 = vector.shape_cast %29 : vector<1x1x65x34xf32> to vector<65x34xf32>
    %cst_18 = arith.constant dense<0.000000e+00> : vector<8x34xf32>
    %31 = tpu.matmul %0, %30, %cst_18 {dimension_numbers = #tpu.dot_dimension_numbers<[1], [0], [0], [1], [0, 0, 1, 1], [], []>} : vector<8x65xf32>, vector<65x34xf32>, vector<8x34xf32> -> vector<8x34xf32>
    %32 = vector.broadcast %20 : vector<8x1xf32> to vector<8x34xf32>
    %33 = arith.subf %31, %32 : vector<8x34xf32>
    %34 = vector.broadcast %17 : f32 to vector<8x34xf32>
    %35 = arith.mulf %33, %34 : vector<8x34xf32>
    %36 = math.absf %35 : vector<8x34xf32>
    %37 = arith.maximumf %28, %36 : vector<8x34xf32>
    %c0_19 = arith.constant 0 : index
    %c2 = arith.constant 2 : index
    %c0_20 = arith.constant 0 : index
    %c0_21 = arith.constant 0 : index
    %38 = vector.load %arg2[%c0_19, %c2, %c0_20, %c0_21] : memref<1x4x65x34xf32, #tpu.memory_space<vmem>>, vector<1x1x65x34xf32>
    %39 = vector.shape_cast %38 : vector<1x1x65x34xf32> to vector<65x34xf32>
    %cst_22 = arith.constant dense<0.000000e+00> : vector<8x34xf32>
    %40 = tpu.matmul %0, %39, %cst_22 {dimension_numbers = #tpu.dot_dimension_numbers<[1], [0], [0], [1], [0, 0, 1, 1], [], []>} : vector<8x65xf32>, vector<65x34xf32>, vector<8x34xf32> -> vector<8x34xf32>
    %41 = vector.broadcast %20 : vector<8x1xf32> to vector<8x34xf32>
    %42 = arith.subf %40, %41 : vector<8x34xf32>
    %43 = vector.broadcast %17 : f32 to vector<8x34xf32>
    %44 = arith.mulf %42, %43 : vector<8x34xf32>
    %45 = math.absf %44 : vector<8x34xf32>
    %c0_23 = arith.constant 0 : index
    %c3 = arith.constant 3 : index
    %c0_24 = arith.constant 0 : index
    %c0_25 = arith.constant 0 : index
    %46 = vector.load %arg2[%c0_23, %c3, %c0_24, %c0_25] : memref<1x4x65x34xf32, #tpu.memory_space<vmem>>, vector<1x1x65x34xf32>
    %47 = vector.shape_cast %46 : vector<1x1x65x34xf32> to vector<65x34xf32>
    %cst_26 = arith.constant dense<0.000000e+00> : vector<8x34xf32>
    %48 = tpu.matmul %0, %47, %cst_26 {dimension_numbers = #tpu.dot_dimension_numbers<[1], [0], [0], [1], [0, 0, 1, 1], [], []>} : vector<8x65xf32>, vector<65x34xf32>, vector<8x34xf32> -> vector<8x34xf32>
    %49 = vector.broadcast %20 : vector<8x1xf32> to vector<8x34xf32>
    %50 = arith.subf %48, %49 : vector<8x34xf32>
    %51 = vector.broadcast %17 : f32 to vector<8x34xf32>
    %52 = arith.mulf %50, %51 : vector<8x34xf32>
    %53 = math.absf %52 : vector<8x34xf32>
    %54 = arith.maximumf %45, %53 : vector<8x34xf32>
    %55 = vector.shape_cast %37 : vector<8x34xf32> to vector<1x8x34xf32>
    %cst_27 = arith.constant dense<0.000000e+00> : vector<1xf32>
    %56 = vector.multi_reduction <add>, %55, %cst_27 [1, 2] : vector<1x8x34xf32> to vector<1xf32>
    %57 = vector.shape_cast %56 : vector<1xf32> to vector<1x1x1xf32>
    %58 = vector.extract %57[0, 0, 0] : f32 from vector<1x1x1xf32>
    %59 = vector.shape_cast %54 : vector<8x34xf32> to vector<1x8x34xf32>
    %cst_28 = arith.constant dense<0.000000e+00> : vector<1xf32>
    %60 = vector.multi_reduction <add>, %59, %cst_28 [1, 2] : vector<1x8x34xf32> to vector<1xf32>
    %61 = vector.shape_cast %60 : vector<1xf32> to vector<1x1x1xf32>
    %62 = vector.extract %61[0, 0, 0] : f32 from vector<1x1x1xf32>
    %63 = arith.addf %58, %62 : f32
    %cst_29 = arith.constant 5.440000e+02 : f32
    %64 = arith.divf %63, %cst_29 : f32
    %65 = vector.broadcast %64 : f32 to vector<8x34xf32>
    %66 = arith.subf %37, %65 : vector<8x34xf32>
    %67 = arith.mulf %66, %66 : vector<8x34xf32>
    %68 = vector.shape_cast %67 : vector<8x34xf32> to vector<1x8x34xf32>
    %cst_30 = arith.constant dense<0.000000e+00> : vector<1xf32>
    %69 = vector.multi_reduction <add>, %68, %cst_30 [1, 2] : vector<1x8x34xf32> to vector<1xf32>
    %70 = vector.shape_cast %69 : vector<1xf32> to vector<1x1x1xf32>
    %71 = vector.extract %70[0, 0, 0] : f32 from vector<1x1x1xf32>
    %72 = vector.broadcast %64 : f32 to vector<8x34xf32>
    %73 = arith.subf %54, %72 : vector<8x34xf32>
    %74 = arith.mulf %73, %73 : vector<8x34xf32>
    %75 = vector.shape_cast %74 : vector<8x34xf32> to vector<1x8x34xf32>
    %cst_31 = arith.constant dense<0.000000e+00> : vector<1xf32>
    %76 = vector.multi_reduction <add>, %75, %cst_31 [1, 2] : vector<1x8x34xf32> to vector<1xf32>
    %77 = vector.shape_cast %76 : vector<1xf32> to vector<1x1x1xf32>
    %78 = vector.extract %77[0, 0, 0] : f32 from vector<1x1x1xf32>
    %79 = arith.addf %71, %78 : f32
    %cst_32 = arith.constant 5.440000e+02 : f32
    %80 = arith.divf %79, %cst_32 : f32
    %cst_33 = arith.constant 9.99999974E-6 : f32
    %81 = arith.addf %80, %cst_33 : f32
    %82 = math.rsqrt %81 : f32
    %83 = vector.broadcast %64 : f32 to vector<8x34xf32>
    %84 = arith.subf %37, %83 : vector<8x34xf32>
    %85 = vector.broadcast %82 : f32 to vector<8x34xf32>
    %86 = arith.mulf %84, %85 : vector<8x34xf32>
    %87 = vector.broadcast %64 : f32 to vector<8x34xf32>
    %88 = arith.subf %54, %87 : vector<8x34xf32>
    %89 = vector.broadcast %82 : f32 to vector<8x34xf32>
    %90 = arith.mulf %88, %89 : vector<8x34xf32>
    %cst_34 = arith.constant 0.000000e+00 : f32
    %91 = vector.broadcast %cst_34 : f32 to vector<8x34xf32>
    %92 = arith.maximumf %86, %91 : vector<8x34xf32>
    %cst_35 = arith.constant 0.000000e+00 : f32
    %93 = vector.broadcast %cst_35 : f32 to vector<8x34xf32>
    %94 = arith.maximumf %90, %93 : vector<8x34xf32>
    %95 = vector.extract_strided_slice %92 {offsets = [0, 0], sizes = [8, 32], strides = [1, 1]} : vector<8x34xf32> to vector<8x32xf32>
    %96 = vector.extract_strided_slice %94 {offsets = [0, 0], sizes = [8, 32], strides = [1, 1]} : vector<8x34xf32> to vector<8x32xf32>
    %97 = vector.extract_strided_slice %92 {offsets = [0, 1], sizes = [8, 32], strides = [1, 1]} : vector<8x34xf32> to vector<8x32xf32>
    %98 = vector.extract_strided_slice %94 {offsets = [0, 1], sizes = [8, 32], strides = [1, 1]} : vector<8x34xf32> to vector<8x32xf32>
    %99 = vector.extract_strided_slice %92 {offsets = [0, 2], sizes = [8, 32], strides = [1, 1]} : vector<8x34xf32> to vector<8x32xf32>
    %100 = tpu.concatenate %95, %96, %97, %98, %99 in 0 : vector<8x32xf32>, vector<8x32xf32>, vector<8x32xf32>, vector<8x32xf32>, vector<8x32xf32> -> vector<40x32xf32>
    %101 = vector.extract_strided_slice %94 {offsets = [0, 0], sizes = [8, 32], strides = [1, 1]} : vector<8x34xf32> to vector<8x32xf32>
    %102 = vector.extract_strided_slice %92 {offsets = [0, 1], sizes = [8, 32], strides = [1, 1]} : vector<8x34xf32> to vector<8x32xf32>
    %103 = vector.extract_strided_slice %94 {offsets = [0, 1], sizes = [8, 32], strides = [1, 1]} : vector<8x34xf32> to vector<8x32xf32>
    %104 = vector.extract_strided_slice %92 {offsets = [0, 2], sizes = [8, 32], strides = [1, 1]} : vector<8x34xf32> to vector<8x32xf32>
    %105 = vector.extract_strided_slice %94 {offsets = [0, 2], sizes = [8, 32], strides = [1, 1]} : vector<8x34xf32> to vector<8x32xf32>
    %106 = tpu.concatenate %101, %102, %103, %104, %105 in 0 : vector<8x32xf32>, vector<8x32xf32>, vector<8x32xf32>, vector<8x32xf32>, vector<8x32xf32> -> vector<40x32xf32>
    %c0_36 = arith.constant 0 : index
    %c0_37 = arith.constant 0 : index
    %107 = vector.load %arg5[%c0_36, %c0_37] : memref<8x40xf32, #tpu.memory_space<vmem>>, vector<8x40xf32>
    %c0_38 = arith.constant 0 : index
    %c0_39 = arith.constant 0 : index
    %108 = vector.load %arg6[%c0_38, %c0_39] : memref<8x1xf32, #tpu.memory_space<vmem>>, vector<8x1xf32>
    %cst_40 = arith.constant dense<0.000000e+00> : vector<8x32xf32>
    %109 = tpu.matmul %107, %100, %cst_40 {dimension_numbers = #tpu.dot_dimension_numbers<[1], [0], [0], [1], [0, 0, 1, 1], [], []>} : vector<8x40xf32>, vector<40x32xf32>, vector<8x32xf32> -> vector<8x32xf32>
    %110 = vector.broadcast %108 : vector<8x1xf32> to vector<8x32xf32>
    %111 = arith.addf %109, %110 : vector<8x32xf32>
    %112 = math.absf %111 : vector<8x32xf32>
    %cst_41 = arith.constant dense<0.000000e+00> : vector<8x32xf32>
    %113 = tpu.matmul %107, %106, %cst_41 {dimension_numbers = #tpu.dot_dimension_numbers<[1], [0], [0], [1], [0, 0, 1, 1], [], []>} : vector<8x40xf32>, vector<40x32xf32>, vector<8x32xf32> -> vector<8x32xf32>
    %114 = vector.broadcast %108 : vector<8x1xf32> to vector<8x32xf32>
    %115 = arith.addf %113, %114 : vector<8x32xf32>
    %116 = math.absf %115 : vector<8x32xf32>
    %117 = arith.maximumf %112, %116 : vector<8x32xf32>
    %118 = vector.shape_cast %117 : vector<8x32xf32> to vector<1x8x32xf32>
    %cst_42 = arith.constant dense<0.000000e+00> : vector<1xf32>
    %119 = vector.multi_reduction <add>, %118, %cst_42 [1, 2] : vector<1x8x32xf32> to vector<1xf32>
    %120 = vector.shape_cast %119 : vector<1xf32> to vector<1x1x1xf32>
    %121 = vector.extract %120[0, 0, 0] : f32 from vector<1x1x1xf32>
    %cst_43 = arith.constant 2.560000e+02 : f32
    %122 = arith.divf %121, %cst_43 : f32
    %123 = vector.broadcast %122 : f32 to vector<8x32xf32>
    %124 = arith.subf %117, %123 : vector<8x32xf32>
    %125 = arith.mulf %124, %124 : vector<8x32xf32>
    %126 = vector.shape_cast %125 : vector<8x32xf32> to vector<1x8x32xf32>
    %cst_44 = arith.constant dense<0.000000e+00> : vector<1xf32>
    %127 = vector.multi_reduction <add>, %126, %cst_44 [1, 2] : vector<1x8x32xf32> to vector<1xf32>
    %128 = vector.shape_cast %127 : vector<1xf32> to vector<1x1x1xf32>
    %129 = vector.extract %128[0, 0, 0] : f32 from vector<1x1x1xf32>
    %cst_45 = arith.constant 2.560000e+02 : f32
    %130 = arith.divf %129, %cst_45 : f32
    %cst_46 = arith.constant 9.99999974E-6 : f32
    %131 = arith.addf %130, %cst_46 : f32
    %132 = math.rsqrt %131 : f32
    %133 = vector.broadcast %122 : f32 to vector<8x32xf32>
    %134 = arith.subf %117, %133 : vector<8x32xf32>
    %135 = vector.broadcast %132 : f32 to vector<8x32xf32>
    %136 = arith.mulf %134, %135 : vector<8x32xf32>
    %cst_47 = arith.constant 0.000000e+00 : f32
    %137 = vector.broadcast %cst_47 : f32 to vector<8x32xf32>
    %138 = arith.maximumf %136, %137 : vector<8x32xf32>
    %c0_48 = arith.constant 0 : index
    %c0_49 = arith.constant 0 : index
    %c0_50 = arith.constant 0 : index
    %139 = vector.load %arg7[%c0_48, %c0_49, %c0_50] : memref<1x8x32xf32, #tpu.memory_space<vmem>>, vector<1x8x32xf32>
    %140 = vector.shape_cast %139 : vector<1x8x32xf32> to vector<8x32xf32>
    %141 = vector.shape_cast %138 : vector<8x32xf32> to vector<1x8x32xf32>
    tpu.vector_store %arg7[%c0_48, %c0_49, %c0_50], %141 {strides = array<i32>} : memref<1x8x32xf32, #tpu.memory_space<vmem>>, vector<1x8x32xf32>,
    return
  }
  func.func @transform_0(%arg0: i32) -> (i32, i32, i32) {
    %c0_i32 = arith.constant 0 : i32
    %c0_i32_0 = arith.constant 0 : i32
    %c0_i32_1 = arith.constant 0 : i32
    return %arg0, %c0_i32, %c0_i32_0 : i32, i32, i32
  }
  func.func @transform_1(%arg0: i32) -> (i32, i32, i32, i32) {
    %c0_i32 = arith.constant 0 : i32
    %c0_i32_0 = arith.constant 0 : i32
    %c0_i32_1 = arith.constant 0 : i32
    %c0_i32_2 = arith.constant 0 : i32
    return %arg0, %c0_i32, %c0_i32_0, %c0_i32_1 : i32, i32, i32, i32
  }
  func.func @transform_2(%arg0: i32) -> (i32, i32) {
    %c0_i32 = arith.constant 0 : i32
    %c0_i32_0 = arith.constant 0 : i32
    %c0_i32_1 = arith.constant 0 : i32
    return %c0_i32, %c0_i32_0 : i32, i32
  }
  func.func @transform_3(%arg0: i32) -> (i32, i32) {
    %c0_i32 = arith.constant 0 : i32
    %c0_i32_0 = arith.constant 0 : i32
    %c0_i32_1 = arith.constant 0 : i32
    return %c0_i32, %c0_i32_0 : i32, i32
  }
  func.func @transform_4(%arg0: i32) -> (i32, i32) {
    %c0_i32 = arith.constant 0 : i32
    %c0_i32_0 = arith.constant 0 : i32
    %c0_i32_1 = arith.constant 0 : i32
    return %c0_i32, %c0_i32_0 : i32, i32
  }
  func.func @transform_5(%arg0: i32) -> (i32, i32) {
    %c0_i32 = arith.constant 0 : i32
    %c0_i32_0 = arith.constant 0 : i32
    %c0_i32_1 = arith.constant 0 : i32
    return %c0_i32, %c0_i32_0 : i32, i32
  }
  func.func @transform_6(%arg0: i32) -> (i32, i32, i32) {
    %c0_i32 = arith.constant 0 : i32
    %c0_i32_0 = arith.constant 0 : i32
    %c0_i32_1 = arith.constant 0 : i32
    return %arg0, %c0_i32, %c0_i32_0 : i32, i32, i32
  }
}

</mosaic_0001>

<bundles_post_ra>
// kernel: forward.1
= control target key start
LH: loop header
LB: loop body
LE: loop exit
PB: predicated region body
PF: predicated region fallthrough
CT: control target
= control target key end

     0   :  { %s1384_s21 = smov 0   ;;  %s1533_s0 = inlined_call_operand.vmem [shape: f32[2,1,200], index: 0, kind: input, shape index: {}]   ;;  %s1534_s1 = inlined_call_operand.vmem [shape: f32[2,4,65,34], index: 1, kind: input, shape index: {}]   ;;  %s1535_s2 = inlined_call_operand.vmem [shape: f32[8,65], index: 2, kind: input, shape index: {}]   ;;  %s1536_s3 = inlined_call_operand.vmem [shape: f32[8,1], index: 3, kind: input, shape index: {}]   ;;  %s1537_s4 = inlined_call_operand.vmem [shape: f32[8,40], index: 4, kind: input, shape index: {}]   ;;  %s1538_s5 = inlined_call_operand.vmem [shape: f32[8,1], index: 5, kind: input, shape index: {}]   ;;  %s1539_s6 = inlined_call_operand.vmem [shape: f32[2,8,32], index: 6, kind: output, shape index: {}]  }
   0x1 LB: > { %s1021_s22 = sadd.s32 4294967295, %s1341_s21   ;;  %p1025_p0 = scmp.ge.s32.totalorder %s1341_s21, 1  ;;  %s1341_s21 = sphi %s1384_s21, %s16_s21  }
   0x2   : > { %p221_p1 = scmp.lt.s32.totalorder %s1341_s21, 3 }
   0x4   : > { %p222_p2 = pnand %p1025_p0, %p221_p1 }
   0x5   : > { %p254_p3 = scmp.lt.s32.totalorder (!%p222_p2), %s1021_s22, 1  ;;  %v270_v0 = vlaneseq (!%p222_p2)  ;;  %v1343_v1 = vmov (!%p222_p2), 0.0|0.0   ;;  %vm1344_vm0 = vmmov (!%p222_p2), 0   ;;  %v1345_v3 = vmov (!%p222_p2), 0.0   ;;  %v267_v42 = vld [vmem:[%s1535_s2] sm:$0xff] (!%p222_p2)  ;;  %s1347_s29 = smov (!%p222_p2), 127  }
   0x6   : > { %225 = sbr.rel (%p222_p2) target bundleno = 1846 (0x736), region = 44  ;;  %1230 = vmatprep.subr.bf16.mxu0 (!%p222_p2), %v1343_v1  ;;  %1242 = vmatprep.subr.bf16.mxu1 (!%p222_p2), %v1343_v1  ;;  %vm280_vm1 = vcmask (!%p222_p2), 1040384   ;;  %vm282_vm2 = vcmask (!%p222_p2), 581632   ;;  %vm341_vm3 = vcmask (!%p222_p2), 531456   ;;  %vm687_vm4 = vcmask (!%p222_p2), 277504  }
   0x7   : > { %v1396_v2 = vshrl.u32 (!%p222_p2), %v270_v0, 7  ;;  %1138 = vmatprep.mubr.msk.f32.mxu0 (!%p222_p2), %vm1344_vm0, %v1345_v3  ;;  %1159 = vmatprep.mubr.msk.f32.mxu1 (!%p222_p2), %vm1344_vm0, %v1345_v3  ;;  %vm771_vm5 = vcmask (!%p222_p2), 326656   ;;  %vm918_vm6 = vcmask (!%p222_p2), 261120  }
   0x9   : > { %v272_v4 = vsub.s32 (!%p222_p2), 0, %v1396_v2  ;;  %v276_v5 = vsub.s32 (!%p222_p2), 1, %v1396_v2 }
   0xd   : > { %s1541_s22 = smov (!%p254_p3, %s1021_s22), 1 }
   0xe   : > { %s1026_s23 = sshll.u32 %s1541_s22, 1  ;;  %s1290_s24 = smul.u32 288, %s1541_s22 }
   0xf   : > { %s257_s27 = scalar_lea.vmem %s1533_s0, %s1026_s23 }
  0x10   : > { %s1412_s30 = scalar_lea.vmem %s1534_s1, %s1290_s24  ;;  %v1414_v6 = vld [vmem:[%s257_s27] sm:$0x3] }
  0x11   : > { %v273_v7 = vrot.slane %v1414_v6, %v272_v4  ;;  %v277_v8 = vrot.slane %v1414_v6, %v276_v5  ;;  %v332_v9 = vld [vmem:[%s1412_s30] sm:$0xff]  ;;  %v333_v10 = vld [vmem:[%s1412_s30 + $0x8] sm:$0xff]  ;;  %v1032_v13 = vld [vmem:[%s1412_s30 + $0x50] sm:$0xff] }
  0x12   : > { %v1031_v11 = vld [vmem:[%s1412_s30 + $0x48] sm:$0xff]  ;;  %v1231_v12 = vpack.c.bf16 %v333_v10, %v332_v9  ;;  %v334_v14 = vld [vmem:[%s1412_s30 + $0x10] sm:$0xff]  ;;  %v335_v15 = vld [vmem:[%s1412_s30 + $0x18] sm:$0xff] }
  0x13   : > { %v281_v16 = vsel %vm280_vm1, %v273_v7, 0.0  ;;  %v283_v17 = vsel %vm282_vm2, %v277_v8, 0.0  ;;  %v1243_v18 = vpack.c.bf16 %v1032_v13, %v1031_v11  ;;  %v1033_v19 = vld [vmem:[%s1412_s30 + $0x58] sm:$0xff]  ;;  %v1034_v20 = vld [vmem:[%s1412_s30 + $0x60] sm:$0xff]  ;;  %v1234_v22 = vpack.c.bf16 %v335_v15, %v334_v14  ;;  %v337_v25 = vld [vmem:[%s1412_s30 + $0x28] sm:$0xff] }
  0x14   : > { %v284_v21 = vadd.f32 %v283_v17, %v281_v16  ;;  %1232 = vmatpush3.bf16.msra.mxu0 %v1231_v12  ;;  %v1246_v23 = vpack.c.bf16 %v1034_v20, %v1033_v19  ;;  %v336_v24 = vld [vmem:[%s1412_s30 + $0x20] sm:$0xff]  ;;  %v1035_v26 = vld [vmem:[%s1412_s30 + $0x68] sm:$0xff]  ;;  %v1036_v27 = vld [vmem:[%s1412_s30 + $0x70] sm:$0xff]  ;;  %v1346_v7 = vmov 0  }
  0x15   : > { %1244 = vmatpush3.bf16.msra.mxu1 %v1243_v18  ;;  %1233 = vmatprep.subr.bf16.mxu0 %v1343_v1  ;;  %v1237_v28 = vpack.c.bf16 %v337_v25, %v336_v24  ;;  %v1249_v29 = vpack.c.bf16 %v1036_v27, %v1035_v26  ;;  %v338_v30 = vld [vmem:[%s1412_s30 + $0x30] sm:$0xff]  ;;  %v339_v31 = vld [vmem:[%s1412_s30 + $0x38] sm:$0xff]  ;;  %v1038_v33 = vld [vmem:[%s1412_s30 + $0x80] sm:$0xff] }
  0x16   : > { %285 = vadd.xlane.f32.xlu0 %v284_v21  ;;  %1245 = vmatprep.subr.bf16.mxu1 %v1343_v1  ;;  %v1037_v32 = vld [vmem:[%s1412_s30 + $0x78] sm:$0xff]  ;;  %v1240_v34 = vpack.c.bf16 %v339_v31, %v338_v30  ;;  %v1042_v36 = vld [vmem:[%s1412_s30 + $0x90] sm:$0xff]  ;;  %v340_v38 = vld [vmem:[%s1412_s30 + $0x40] sm:$0x1] }
  0x17   : > { %v1252_v35 = vpack.c.bf16 %v1038_v33, %v1037_v32  ;;  %v1043_v37 = vld [vmem:[%s1412_s30 + $0x98] sm:$0xff]  ;;  %v1054_v40 = vld [vmem:[%s1412_s30 + $0xe0] sm:$0xff]  ;;  %v1039_v41 = vld [vmem:[%s1412_s30 + $0x88] sm:$0x1]  ;;  %1327 = vset.pattern.permute.xlu1 %v1346_v7  ;;  %1328 = vset.pattern.permute.xlu0 %v1346_v7 }
  0x18   : > { %1235 = vmatpush3.bf16.msra.mxu0 %v1234_v22  ;;  %v1053_v39 = vld [vmem:[%s1412_s30 + $0xd8] sm:$0xff]  ;;  %v1255_v43 = vpack.c.bf16 %v1043_v37, %v1042_v36  ;;  %v1044_v45 = vld [vmem:[%s1412_s30 + $0xa0] sm:$0xff]  ;;  %v1045_v46 = vld [vmem:[%s1412_s30 + $0xa8] sm:$0xff] }
  0x19   : > { %1247 = vmatpush3.bf16.msra.mxu1 %v1246_v23  ;;  %1236 = vmatprep.subr.bf16.mxu0 %v1343_v1  ;;  %v1267_v44 = vpack.c.bf16 %v1054_v40, %v1053_v39  ;;  %v1055_v47 = vld [vmem:[%s1412_s30 + $0xe8] sm:$0xff]  ;;  %v1056_v48 = vld [vmem:[%s1412_s30 + $0xf0] sm:$0xff]  ;;  %v1258_v49 = vpack.c.bf16 %v1045_v46, %v1044_v45  ;;  %v1047_v52 = vld [vmem:[%s1412_s30 + $0xb8] sm:$0xff] }
  0x1a   : > { %1248 = vmatprep.subr.bf16.mxu1 %v1343_v1  ;;  %v1270_v50 = vpack.c.bf16 %v1056_v48, %v1055_v47  ;;  %v1046_v51 = vld [vmem:[%s1412_s30 + $0xb0] sm:$0xff]  ;;  %v1057_v53 = vld [vmem:[%s1412_s30 + $0xf8] sm:$0xff]  ;;  %v1058_v54 = vld [vmem:[%s1412_s30 + $0x100] sm:$0xff] }
  0x1b   : > { %v1261_v55 = vpack.c.bf16 %v1047_v52, %v1046_v51  ;;  %v1273_v56 = vpack.c.bf16 %v1058_v54, %v1057_v53  ;;  %v1048_v57 = vld [vmem:[%s1412_s30 + $0xc0] sm:$0xff]  ;;  %v1049_v58 = vld [vmem:[%s1412_s30 + $0xc8] sm:$0xff]  ;;  %v1060_v60 = vld [vmem:[%s1412_s30 + $0x110] sm:$0xff] }
  0x1c   : > { %1238 = vmatpush3.bf16.msra.mxu0 %v1237_v28  ;;  %v1059_v59 = vld [vmem:[%s1412_s30 + $0x108] sm:$0xff]  ;;  %v1264_v61 = vpack.c.bf16 %v1049_v58, %v1048_v57  ;;  %v1050_v63 = vld [vmem:[%s1412_s30 + $0xd0] sm:$0x1]  ;;  %v1061_v0 = vld [vmem:[%s1412_s30 + $0x118] sm:$0x1]  ;;  %s1348_s30 = smov 126  }
  0x1d   : > { %1250 = vmatpush3.bf16.msra.mxu1 %v1249_v29  ;;  %1239 = vmatprep.subr.bf16.mxu0 %v1343_v1  ;;  %v1276_v62 = vpack.c.bf16 %v1060_v60, %v1059_v59  ;;  %v330_v15 = vld [vmem:[%s1536_s3] sm:$0xff] }
  0x1e   : > { %1251 = vmatprep.subr.bf16.mxu1 %v1343_v1 }
  0x20   : > { %1241 = vmatpush3.bf16.msra.mxu0 %v1240_v34 }
  0x21   : > { %1253 = vmatpush3.bf16.msra.mxu1 %v1252_v35  ;;  %1136 = vmatprep.subr.mxu0 %v1345_v3 }
  0x22   : > { %1157 = vmatprep.subr.mxu1 %v1345_v3 }
  0x24   : > { %1137 = vmatpush3.msk.msra.mxu0 %vm280_vm1, %v340_v38 }
  0x25   : > { %1158 = vmatpush3.msk.msra.mxu1 %vm280_vm1, %v1039_v41  ;;  %1254 = vmatprep.subr.bf16.mxu0 %v1343_v1 }
  0x26   : > { %1266 = vmatprep.subr.bf16.mxu1 %v1343_v1  ;;  %1139 = vmatmul.mubr.msk.f32.vlgmr.msra.gmra.mrb[0].mxu0 %vm341_vm3, %v267_v42 }
  0x27   : > { %1160 = vmatmul.mubr.msk.f32.vlgmr.msra.gmra.mrb[0].mxu1 %vm341_vm3, %v267_v42  ;;  %1256 = vmatpush3.bf16.msra.mxu0 %v1255_v43 }
  0x28   : > { %1268 = vmatpush3.bf16.msra.mxu1 %v1267_v44  ;;  %1257 = vmatprep.subr.bf16.mxu0 %v1343_v1 }
  0x29   : > { %1269 = vmatprep.subr.bf16.mxu1 %v1343_v1  ;;  %1180 = vmatprep.mubr.msk.f32.mxu0 %vm1344_vm0, %v1345_v3 }
  0x2a   : > { %1201 = vmatprep.mubr.msk.f32.mxu1 %vm1344_vm0, %v1345_v3 }
  0x2b   : > { %1259 = vmatpush3.bf16.msra.mxu0 %v1258_v49 }
  0x2c   : > { %1271 = vmatpush3.bf16.msra.mxu1 %v1270_v50  ;;  %1260 = vmatprep.subr.bf16.mxu0 %v1343_v1 }
  0x2d   : > { %1272 = vmatprep.subr.bf16.mxu1 %v1343_v1 }
  0x2f   : > { %1262 = vmatpush3.bf16.msra.mxu0 %v1261_v55 }
  0x30   : > { %1274 = vmatpush3.bf16.msra.mxu1 %v1273_v56  ;;  %1263 = vmatprep.subr.bf16.mxu0 %v1343_v1 }
  0x31   : > { %1275 = vmatprep.subr.bf16.mxu1 %v1343_v1 }
  0x33   : > { %1265 = vmatpush3.bf16.msra.mxu0 %v1264_v61 }
  0x34   : > { %1277 = vmatpush3.bf16.msra.mxu1 %v1276_v62  ;;  %1178 = vmatprep.subr.mxu0 %v1345_v3 }
  0x35   : > { %1199 = vmatprep.subr.mxu1 %v1345_v3 }
  0x37   : > { %1179 = vmatpush3.msk.msra.mxu0 %vm280_vm1, %v1050_v63 }
  0x38   : > { %1200 = vmatpush3.msk.msra.mxu1 %vm280_vm1, %v1061_v0  ;;  %1181 = vmatmul.mubr.msk.f32.vlgmr.msra.gmra.mrb[2].mxu0 %vm341_vm3, %v267_v42 }
  0x39   : > { %1202 = vmatmul.mubr.msk.f32.vlgmr.msra.gmra.mrb[2].mxu1 %vm341_vm3, %v267_v42  ;;  %1278 = vmatprep.subr.bf16.mxu0 %v1343_v1 }
  0x3a   : > { %1284 = vmatprep.subr.bf16.mxu1 %v1343_v1  ;;  %1214 = vmatprep.mubr.msk.f32.mxu0 %vm1344_vm0, %v1345_v3 }
  0x3b   : > { %1227 = vmatprep.mubr.msk.f32.mxu1 %vm1344_vm0, %v1345_v3 }
  0xa3   : > { %v286_v8 = vpop.xlane.xlu0 %285 }
  0xa4   : > { %v287_v9 = vrot.slane %v286_v8, 4 }
  0xa6   : > { %v288_v10 = vadd.f32 %v287_v9, %v286_v8 }
  0xa8   : > { %v289_v11 = vrot.slane %v288_v10, 2 }
  0xaa   : > { %v290_v12 = vadd.f32 %v289_v11, %v288_v10 }
  0xac   : > { %v291_v13 = vrot.slane %v290_v12, 1 }
  0xae   : > { %v292_v14 = vadd.f32 %v291_v13, %v290_v12 }
  0xb0   : > { %1291 = vpush %v292_v14 }
  0xe1   : > { %s1292_s9 = spop %1291 }
  0xe2   : > { %s296_s10 = smul.f32 0.005, %s1292_s9 }
  0xe4   : > { %v297_v16 = vstv %s296_s10 }
  0xe5   : > { %v298_v17 = vsub.f32 %v1414_v6, %v297_v16  ;;  %v331_v18 = vmul.f32 %v330_v15, %v297_v16 }
  0xe7   : > { %v299_v19 = vmul.f32 %v298_v17, %v298_v17  ;;  %420 = vperm.xlu1 %1327, %v331_v18  }
  0xe9   : > { %v304_v20 = vrot.slane %v299_v19, %v272_v4  ;;  %v308_v21 = vrot.slane %v299_v19, %v276_v5 }
  0xeb   : > { %v311_v22 = vsel %vm280_vm1, %v304_v20, 0.0  ;;  %v312_v23 = vsel %vm282_vm2, %v308_v21, 0.0 }
  0xec   : > { %v313_v24 = vadd.f32 %v312_v23, %v311_v22 }
  0xee   : > { %314 = vadd.xlane.f32.xlu0 %v313_v24 }
  0xf9   : > { %v414_v25 = vpop.f32.mrb[0].mxu0 }
  0xfa   : > { %v506_v26 = vpop.f32.mrb[0].mxu1  ;;  %v1140_v27 = vpop.f32.mrb[1].mxu0 }
  0xfb   : > { %v1161_v28 = vpop.f32.mrb[1].mxu1 }
 0x10b   : > { %v593_v6 = vpop.f32.mrb[2].mxu0 }
 0x10c   : > { %v679_v29 = vpop.f32.mrb[2].mxu1  ;;  %v1182_v30 = vpop.f32.mrb[3].mxu0 }
 0x10d   : > { %v1203_v31 = vpop.f32.mrb[3].mxu1 }
 0x166   : > { %v421_v38 = vpop.permute.xlu1 %420 }
 0x167   : > { %v423_v39 = vsub.f32 %v414_v25, %v421_v38  ;;  %v510_v40 = vsub.f32 %v506_v26, %v421_v38  ;;  %v597_v41 = vsub.f32 %v593_v6, %v421_v38  ;;  %v683_v42 = vsub.f32 %v679_v29, %v421_v38 }
 0x17b   : > { %v315_v32 = vpop.xlane.xlu0 %314 }
 0x17c   : > { %v316_v33 = vrot.slane %v315_v32, 4 }
 0x17e   : > { %v317_v4 = vadd.f32 %v316_v33, %v315_v32 }
 0x180   : > { %v318_v34 = vrot.slane %v317_v4, 2 }
 0x182   : > { %v319_v2 = vadd.f32 %v318_v34, %v317_v4 }
 0x184   : > { %v320_v5 = vrot.slane %v319_v2, 1 }
 0x186   : > { %v321_v35 = vadd.f32 %v320_v5, %v319_v2 }
 0x188   : > { %1293 = vpush %v321_v35 }
 0x1b9   : > { %s1294_s13 = spop %1293 }
 0x1ba   : > { %s325_s14 = smul.f32 0.005, %s1294_s13 }
 0x1bc   : > { %s326_s15 = sadd.f32 1e-05, %s325_s14 }
 0x1be   : > { %v327_v36 = vstv %s326_s15 }
 0x1bf   : > { %1329 = vrsqrt.f32 %v327_v36 }
 0x1c9   : > { %v1330_v37 = vpop.eup %1329 }
 0x1ca   : > { %1295 = vpush %v1330_v37  ;;  %v765_v37 = vld [vmem:[%s1538_s5] sm:$0xff] }
 0x1fb   : > { %s1296_s16 = spop %1295 }
 0x1fc   : > { %v424_v43 = vstv %s1296_s16  ;;  %s1028_s16 = sshll.u32 %s1541_s22, 3 }
 0x1fd   : > { %v425_v44 = vmul.f32 %v424_v43, %v423_v39  ;;  %v511_v45 = vmul.f32 %v510_v40, %v424_v43  ;;  %v598_v46 = vmul.f32 %v597_v41, %v424_v43  ;;  %v684_v47 = vmul.f32 %v683_v42, %v424_v43 }
 0x1ff   : > { %v599_v48 = vand.u32 2147483647, %v598_v46  ;;  %v685_v49 = vand.u32 2147483647, %v684_v47  ;;  %v426_v50 = vand.u32 2147483647, %v425_v44 }
 0x200   : > { %v512_v51 = vand.u32 2147483647, %v511_v45  ;;  %v764_v44 = vld [vmem:[%s1537_s4] sm:$0xff] }
 0x201   : > { %v686_v52 = vmax.f32.f32 %v599_v48, %v685_v49 }
 0x202   : > { %v513_v53 = vmax.f32.f32 %v426_v50, %v512_v51 }
 0x203   : > { %v698_v54 = vsel %vm687_vm4, %v686_v52, 0.0 }
 0x204   : > { %699 = vadd.xlane.f32.xlu0 %v698_v54  ;;  %v688_v55 = vsel %vm687_vm4, %v513_v53, 0.0 }
 0x205   : > { %689 = vadd.xlane.f32.xlu1 %v688_v55 }
 0x291   : > { %v700_v56 = vpop.xlane.xlu0 %699 }
 0x292   : > { %v701_v57 = vrot.slane %v700_v56, 4  ;;  %v690_v58 = vpop.xlane.xlu1 %689 }
 0x293   : > { %v691_v59 = vrot.slane %v690_v58, 4 }
 0x294   : > { %v702_v60 = vadd.f32 %v701_v57, %v700_v56 }
 0x295   : > { %v692_v61 = vadd.f32 %v691_v59, %v690_v58 }
 0x296   : > { %v703_v62 = vrot.slane %v702_v60, 2 }
 0x297   : > { %v693_v63 = vrot.slane %v692_v61, 2 }
 0x298   : > { %v704_v0 = vadd.f32 %v703_v62, %v702_v60 }
 0x299   : > { %v694_v7 = vadd.f32 %v693_v63, %v692_v61 }
 0x29a   : > { %v705_v8 = vrot.slane %v704_v0, 1 }
 0x29b   : > { %v695_v9 = vrot.slane %v694_v7, 1 }
 0x29c   : > { %v706_v10 = vadd.f32 %v705_v8, %v704_v0 }
 0x29d   : > { %v696_v11 = vadd.f32 %v695_v9, %v694_v7 }
 0x29f   : > { %1297 = vpush %v696_v11 }
 0x2a0   : > { %1299 = vpush %v706_v10 }
 0x2d0   : > { %s1298_s17 = spop %1297 }
 0x2d1   : > { %s1300_s18 = spop %1299 }
 0x2d2   : > { %s708_s19 = sadd.f32 %s1300_s18, %s1298_s17 }
 0x2d4   : > { %s711_s20 = smul.f32 0.0018382353, %s708_s19 }
 0x2d6   : > { %v712_v12 = vstv %s711_s20  ;;  %s266_s20 = scalar_lea.vmem %s1539_s6, %s1028_s16 }
 0x2d7   : > { %v713_v13 = vsub.f32 %v513_v53, %v712_v12  ;;  %v725_v14 = vsub.f32 %v686_v52, %v712_v12 }
 0x2d9   : > { %v714_v15 = vmul.f32 %v713_v13, %v713_v13  ;;  %v726_v17 = vmul.f32 %v725_v14, %v725_v14 }
 0x2db   : > { %v715_v16 = vsel %vm687_vm4, %v714_v15, 0.0  ;;  %v727_v18 = vsel %vm687_vm4, %v726_v17, 0.0 }
 0x2dc   : > { %716 = vadd.xlane.f32.xlu0 %v715_v16 }
 0x2e0   : > { %728 = vadd.xlane.f32.xlu0 %v727_v18 }
 0x369   : > { %v717_v19 = vpop.xlane.xlu0 %716 }
 0x36a   : > { %v718_v20 = vrot.slane %v717_v19, 4 }
 0x36c   : > { %v719_v21 = vadd.f32 %v718_v20, %v717_v19 }
 0x36d   : > { %v729_v22 = vpop.xlane.xlu0 %728 }
 0x36e   : > { %v720_v23 = vrot.slane %v719_v21, 2  ;;  %v730_v24 = vrot.slane %v729_v22, 4 }
 0x370   : > { %v731_v25 = vadd.f32 %v730_v24, %v729_v22  ;;  %v721_v26 = vadd.f32 %v720_v23, %v719_v21 }
 0x372   : > { %v732_v27 = vrot.slane %v731_v25, 2  ;;  %v722_v28 = vrot.slane %v721_v26, 1 }
 0x374   : > { %v723_v6 = vadd.f32 %v722_v28, %v721_v26  ;;  %v733_v29 = vadd.f32 %v732_v27, %v731_v25 }
 0x376   : > { %1301 = vpush %v723_v6  ;;  %v734_v30 = vrot.slane %v733_v29, 1 }
 0x378   : > { %v735_v31 = vadd.f32 %v734_v30, %v733_v29 }
 0x37a   : > { %1303 = vpush %v735_v31 }
 0x3a7   : > { %s1302_s23 = spop %1301 }
 0x3ab   : > { %s1304_s24 = spop %1303 }
 0x3ac   : > { %s737_s25 = sadd.f32 %s1304_s24, %s1302_s23 }
 0x3ae   : > { %s740_s26 = smul.f32 0.0018382353, %s737_s25 }
 0x3b0   : > { %s741_s27 = sadd.f32 1e-05, %s740_s26 }
 0x3b2   : > { %v742_v32 = vstv %s741_s27 }
 0x3b3   : > { %1331 = vrsqrt.f32 %v742_v32 }
 0x3bd   : > { %v1332_v33 = vpop.eup %1331 }
 0x3be   : > { %1305 = vpush %v1332_v33 }
 0x3ef   : > { %s1306_s28 = spop %1305 }
 0x3f0   : > { %v745_v4 = vstv %s1306_s28 }
 0x3f1   : > { %v746_v34 = vmul.f32 %v745_v4, %v713_v13  ;;  %v747_v2 = vmul.f32 %v745_v4, %v725_v14 }
 0x3f3   : > { %v748_v5 = vmax.f32 %v746_v34, 0.0  ;;  %v749_v35 = vmax.f32 %v747_v2, 0.0 }
 0x3f5   : > { %v1279_v36 = vpack.c.bf16 %v749_v35, %v748_v5  ;;  %755 = vrot.lane.b32.xlu1 %v749_v35, %s1347_s29  ;;  %751 = vrot.lane.b32.xlu0 %v748_v5, %s1347_s29 }
 0x3f7   : > { %1280 = vmatpush3.bf16.msra.mxu0 %v1279_v36 }
 0x3f8   : > { %1281 = vmatprep.subr.bf16.mxu0 %v1343_v1 }
 0x3f9   : > { %758 = vrot.lane.b32.xlu0 %v748_v5, %s1348_s30 }
 0x3fd   : > { %761 = vrot.lane.b32.xlu0 %v749_v35, %s1348_s30 }
 0x401   : > { %768 = vperm.xlu0 %1328, %v765_v37  }
 0x467   : > { %v756_v38 = vpop.permute.xlu1 %755  ;;  %v752_v39 = vpop.permute.xlu0 %751 }
 0x468   : > { %v1282_v40 = vpack.c.bf16 %v756_v38, %v752_v39  ;;  %v1285_v41 = vpack.c.bf16 %v752_v39, %v749_v35 }
 0x46a   : > { %1283 = vmatpush3.bf16.msra.mxu0 %v1282_v40  ;;  %1286 = vmatpush3.bf16.msra.mxu1 %v1285_v41 }
 0x46b   : > { %v759_v42 = vpop.permute.xlu0 %758  ;;  %1212 = vmatprep.subr.mxu0 %v1345_v3  ;;  %1287 = vmatprep.subr.bf16.mxu1 %v1343_v1 }
 0x46c   : > { %v1288_v43 = vpack.c.bf16 %v759_v42, %v756_v38 }
 0x46e   : > { %1213 = vmatpush3.msra.mxu0 %v759_v42  ;;  %1289 = vmatpush3.bf16.msra.mxu1 %v1288_v43 }
 0x46f   : > { %1225 = vmatprep.subr.mxu1 %v1345_v3  ;;  %1215 = vmatmul.mubr.msk.f32.vlgmr.msra.gmra.mrb[4].mxu0 %vm771_vm5, %v764_v44  ;;  %v762_v45 = vpop.permute.xlu0 %761 }
 0x472   : > { %1226 = vmatpush3.msra.mxu1 %v762_v45 }
 0x473   : > { %1228 = vmatmul.mubr.msk.f32.vlgmr.msra.gmra.mrb[4].mxu1 %vm771_vm5, %v764_v44 }
 0x480   : > { %v769_v46 = vpop.permute.xlu0 %768 }
 0x542   : > { %v841_v47 = vpop.f32.mrb[4].mxu0 }
 0x543   : > { %v842_v48 = vadd.f32 %v841_v47, %v769_v46  ;;  %v1216_v49 = vpop.f32.mrb[5].mxu0 }
 0x545   : > { %v845_v1 = vand.u32 2147483647, %v842_v48 }
 0x546   : > { %v912_v50 = vpop.f32.mrb[4].mxu1 }
 0x547   : > { %v913_v51 = vadd.f32 %v912_v50, %v769_v46  ;;  %v1229_v52 = vpop.f32.mrb[5].mxu1 }
 0x549   : > { %v916_v53 = vand.u32 2147483647, %v913_v51 }
 0x54b   : > { %v917_v54 = vmax.f32.f32 %v845_v1, %v916_v53 }
 0x54d   : > { %v919_v55 = vsel %vm918_vm6, %v917_v54, 0.0 }
 0x54e   : > { %920 = vadd.xlane.f32.xlu1 %v919_v55 }
 0x5db   : > { %v921_v56 = vpop.xlane.xlu1 %920 }
 0x5dc   : > { %v922_v3 = vrot.slane %v921_v56, 4 }
 0x5de   : > { %v923_v57 = vadd.f32 %v922_v3, %v921_v56 }
 0x5e0   : > { %v924_v58 = vrot.slane %v923_v57, 2 }
 0x5e2   : > { %v925_v59 = vadd.f32 %v924_v58, %v923_v57 }
 0x5e4   : > { %v926_v60 = vrot.slane %v925_v59, 1 }
 0x5e6   : > { %v927_v61 = vadd.f32 %v926_v60, %v925_v59 }
 0x5e8   : > { %1307 = vpush %v927_v61 }
 0x619   : > { %s1308_s11 = spop %1307 }
 0x61a   : > { %s931_s12 = smul.f32 0.00390625, %s1308_s11 }
 0x61c   : > { %v932_v62 = vstv %s931_s12 }
 0x61d   : > { %v933_v63 = vsub.f32 %v917_v54, %v932_v62 }
 0x61f   : > { %v934_v0 = vmul.f32 %v933_v63, %v933_v63 }
 0x621   : > { %v935_v7 = vsel %vm918_vm6, %v934_v0, 0.0 }
 0x622   : > { %936 = vadd.xlane.f32.xlu0 %v935_v7 }
 0x6af   : > { %v937_v8 = vpop.xlane.xlu0 %936 }
 0x6b0   : > { %v938_v9 = vrot.slane %v937_v8, 4 }
 0x6b2   : > { %v939_v10 = vadd.f32 %v938_v9, %v937_v8 }
 0x6b4   : > { %v940_v11 = vrot.slane %v939_v10, 2 }
 0x6b6   : > { %v941_v12 = vadd.f32 %v940_v11, %v939_v10 }
 0x6b8   : > { %v942_v13 = vrot.slane %v941_v12, 1 }
 0x6ba   : > { %v943_v14 = vadd.f32 %v942_v13, %v941_v12 }
 0x6bc   : > { %1309 = vpush %v943_v14 }
 0x6ed   : > { %s1310_s13 = spop %1309 }
 0x6ee   : > { %s947_s14 = smul.f32 0.00390625, %s1310_s13 }
 0x6f0   : > { %s948_s15 = sadd.f32 1e-05, %s947_s14 }
 0x6f2   : > { %v949_v15 = vstv %s948_s15 }
 0x6f3   : > { %1333 = vrsqrt.f32 %v949_v15 }
 0x6fd   : > { %v1334_v16 = vpop.eup %1333 }
 0x6fe   : > { %1311 = vpush %v1334_v16 }
 0x72f   : > { %s1312_s17 = spop %1311 }
 0x730   : > { %v952_v17 = vstv %s1312_s17 }
 0x731   : > { %v953_v18 = vmul.f32 %v952_v17, %v933_v63 }
 0x733   : > { %v954_v19 = vmax.f32 %v953_v18, 0.0 }
 0x735   : > { %955 = vst.msk [vmem:[%s266_s20] sm:$0xff] %vm918_vm6, %v954_v19 }
 0x736 PF: > { %s16_s21 = sadd.s32 1, %s1341_s21  }
 0x737   : > { %p13_p4 = scmp.ge.s32.totalorder %s16_s21, 4  }
 0x739   :  { %15 = sbr.rel (!%p13_p4) target bundleno = 1 (0x1), region = 80 }

</bundles_post_ra>
